<compile_context>
chip_gen: v7x
topology: tpu7x:2x2x1
jax: 0.10.0
libtpu: 0.0.40
codegen_flags: <defaults>
</compile_context>

<pallas_src>
import jax
import jax.numpy as jnp
from jax.experimental import pallas as pl
from jax.experimental.pallas import tpu as pltpu


def _round_up(x, m):
    return ((x + m - 1) // m) * m


def pack_params(params, compute_dtype=jnp.float32):
    """Pack all 12 weight/bias tensors into one padded (R, 128) slab.

    Call once per parameter update; dueling_q_forward only consumes the slab
    (single parameter DMA, VMEM-resident across the batch grid).
    """
    S = params["w1"].shape[0]
    H1 = params["w1"].shape[1]
    H2 = params["w2"].shape[1]
    H3a = params["w3_1"].shape[1]
    H3b = params["w3_2"].shape[1]
    H3 = H3a + H3b                     # fused head hidden: [value(32) | adv(32)]
    A = params["w4_2"].shape[1]
    HO = A + 1                         # fused head output: [adv(A) | val(1)]

    S_pad = _round_up(max(S, 1), 8)
    W = _round_up(max(H1, H2, H3, HO), 128)   # slab lane width (lane-dense)

    # 8-aligned row offsets of each parameter block inside the slab.
    r_w1 = 0
    r_w2 = r_w1 + S_pad
    r_w3 = r_w2 + _round_up(H1, 8)
    r_w4 = r_w3 + _round_up(H2, 8)
    r_b = r_w4 + _round_up(H3, 8)
    R = r_b + 8

    slab = jnp.zeros((R, W), jnp.float32)
    slab = slab.at[r_w1:r_w1 + S, 0:H1].set(params["w1"])
    slab = slab.at[r_w2:r_w2 + H1, 0:H2].set(params["w2"])
    # Fused fc3: value-stream weights in cols [0, H3a), adv-stream in [H3a, H3).
    slab = slab.at[r_w3:r_w3 + H2, 0:H3a].set(params["w3_1"])
    slab = slab.at[r_w3:r_w3 + H2, H3a:H3].set(params["w3_2"])
    # Block-diagonal fused fc4: value-hidden rows -> column A (val),
    # advantage-hidden rows -> columns [0, A) (adv).
    slab = slab.at[r_w4:r_w4 + H3a, A:A + 1].set(params["w4_1"])
    slab = slab.at[r_w4 + H3a:r_w4 + H3, 0:A].set(params["w4_2"])
    # Biases: one aligned (8, W) band, one row per (fused) layer.
    slab = slab.at[r_b + 0, 0:H1].set(params["b1"].reshape(-1))
    slab = slab.at[r_b + 1, 0:H2].set(params["b2"].reshape(-1))
    slab = slab.at[r_b + 2, 0:H3a].set(params["b3_1"].reshape(-1))
    slab = slab.at[r_b + 2, H3a:H3].set(params["b3_2"].reshape(-1))
    slab = slab.at[r_b + 3, 0:A].set(params["b4_2"].reshape(-1))
    slab = slab.at[r_b + 3, A:A + 1].set(params["b4_1"].reshape(-1))
    slab = slab.astype(compute_dtype)

    return {
        "slab": slab,
        "dims": dict(S=S, H1=H1, H2=H2, H3=H3, A=A, HO=HO),
        "offsets": dict(r_w1=r_w1, r_w2=r_w2, r_w3=r_w3, r_w4=r_w4, r_b=r_b),
    }


def _batch_dim_semantics(num_tiles):
    """CORE_PARALLEL only on v7x-class parts (2 TCs/chip); 'arbitrary' elsewhere."""
    kind = jax.devices()[0].device_kind.lower()
    if "v7" in kind and num_tiles >= 2:
        return (pltpu.CORE_PARALLEL,)
    return ("arbitrary",)


def dueling_q_forward(state, packed, *, block_b=2048):
    """state: (B, state_size) float32.  packed: output of pack_params()."""
    B, S_in = state.shape
    slab = packed["slab"]
    d, o = packed["dims"], packed["offsets"]
    S, H1, H2, H3, A, HO = d["S"], d["H1"], d["H2"], d["H3"], d["A"], d["HO"]
    r_w1, r_w2, r_w3, r_w4, r_b = o["r_w1"], o["r_w2"], o["r_w3"], o["r_w4"], o["r_b"]
    assert S_in == S, "state feature dim mismatch vs packed params"
    R, W = slab.shape
    compute_dtype = slab.dtype

    # Batch tile: big tiles amortise the ~0.35 us/step pipeline overhead and
    # fill the MXU M dimension. bf16 packs 2 rows/sublane -> multiple of 16.
    sub = 16 if compute_dtype == jnp.bfloat16 else 8
    TB = min(block_b, _round_up(B, sub))
    TB = _round_up(TB, 256) if TB >= 256 else _round_up(TB, sub)
    num_tiles = pl.cdiv(B, TB)

    # No padded HBM copy of the activations; ragged tail block is masked by Pallas.
    x = state.astype(compute_dtype)

    def kernel(x_ref, p_ref, out_ref):
        cdt = p_ref.dtype
        xb = x_ref[...]                                    # (TB, S)
        # Static ref slices: only the needed parameter rows/cols are loaded,
        # the slab itself stays VMEM-resident across all grid iterations.
        w1 = p_ref[r_w1:r_w1 + S, 0:H1]
        w2 = p_ref[r_w2:r_w2 + H1, 0:H2]
        w3 = p_ref[r_w3:r_w3 + H2, 0:H3]
        w4 = p_ref[r_w4:r_w4 + H3, 0:HO]
        bias = p_ref[r_b:r_b + 8, :].astype(jnp.float32)   # one aligned (8, W) load
        b1 = bias[0:1, 0:H1]
        b2 = bias[1:2, 0:H2]
        b3 = bias[2:3, 0:H3]
        b4 = bias[3:4, 0:HO]

        # fc1 / fc2 (+ReLU), f32 accumulation on the MXU.
        h = jnp.maximum(jnp.dot(xb, w1, preferred_element_type=jnp.float32) + b1, 0.0)
        h = jnp.maximum(jnp.dot(h.astype(cdt), w2, preferred_element_type=jnp.float32) + b2, 0.0)
        # Fused value+advantage hidden layer (one matmul + ReLU).
        h = jnp.maximum(jnp.dot(h.astype(cdt), w3, preferred_element_type=jnp.float32) + b3, 0.0)
        # Fused block-diagonal head -> (TB, A+1) = [adv | val].
        head = jnp.dot(h.astype(cdt), w4, preferred_element_type=jnp.float32) + b4

        adv = head[:, 0:A]
        val = head[:, A:A + 1]
        out_ref[...] = (val + adv - jnp.mean(adv, axis=1, keepdims=True)).astype(out_ref.dtype)

    # TODO(synk): output stays (TB, A) with A=4 -> thin masked stores; a lane-dense
    # (TB//32, 128) repack is possible but was the lowest-value item in the review.
    out = pl.pallas_call(
        kernel,
        out_shape=jax.ShapeDtypeStruct((B, A), jnp.float32),
        grid=(num_tiles,),
        in_specs=[
            pl.BlockSpec((TB, S), lambda i: (i, 0)),   # batch-tiled activations
            pl.BlockSpec((R, W), lambda i: (0, 0)),    # packed parameter slab, resident
        ],
        out_specs=pl.BlockSpec((TB, A), lambda i: (i, 0)),
        compiler_params=pltpu.CompilerParams(
            dimension_semantics=_batch_dim_semantics(num_tiles),
            vmem_limit_bytes=32 * 1024 * 1024,
        ),
    )(x, slab)
    return out


def init_params(key, state_size, action_size, fc1_size=64, fc2_size=64):
    """Deterministic, PyTorch-Linear-style uniform(-1/sqrt(fan_in), 1/sqrt(fan_in)) init."""
    fc3_1_size = fc3_2_size = 32
    sizes = [
        ("1", state_size, fc1_size),
        ("2", fc1_size, fc2_size),
        ("3_1", fc2_size, fc3_1_size),
        ("4_1", fc3_1_size, 1),
        ("3_2", fc2_size, fc3_2_size),
        ("4_2", fc3_2_size, action_size),
    ]
    params = {}
    for name, fan_in, fan_out in sizes:
        key, kw, kb = jax.random.split(key, 3)
        bound = 1.0 / jnp.sqrt(jnp.float32(fan_in))
        params[f"w{name}"] = jax.random.uniform(
            kw, (fan_in, fan_out), jnp.float32, -bound, bound)
        params[f"b{name}"] = jax.random.uniform(
            kb, (1, fan_out), jnp.float32, -bound, bound)
    return params


def dueling_q_reference(state, params):
    """Plain-JAX reference for numerical sanity check."""
    x = jax.nn.relu(state @ params["w1"] + params["b1"])
    x = jax.nn.relu(x @ params["w2"] + params["b2"])
    val = jax.nn.relu(x @ params["w3_1"] + params["b3_1"]) @ params["w4_1"] + params["b4_1"]
    adv = jax.nn.relu(x @ params["w3_2"] + params["b3_2"]) @ params["w4_2"] + params["b4_2"]
    return val + adv - jnp.mean(adv, axis=1, keepdims=True)


if __name__ == "__main__":
    B, STATE_SIZE, ACTION_SIZE = 2, 8, 4

    key = jax.random.PRNGKey(0)
    key, kstate = jax.random.split(key)
    state = jax.random.normal(kstate, (B, STATE_SIZE), jnp.float32)
    params = init_params(key, STATE_SIZE, ACTION_SIZE)
    packed = pack_params(params)            # packed once, reused for every forward

    out = jax.block_until_ready(dueling_q_forward(state, packed))
    ref = dueling_q_reference(state, params)
    assert out.shape == (B, ACTION_SIZE)
    assert jnp.allclose(out, ref, atol=1e-5, rtol=1e-5), "mismatch vs reference (B=2)"

    # Multi-step grid with a ragged tail block (200 = 3*64 + 8), no padded copy.
    key, kbig = jax.random.split(key)
    state_big = jax.random.normal(kbig, (200, STATE_SIZE), jnp.float32)
    out_big = jax.block_until_ready(dueling_q_forward(state_big, packed, block_b=64))
    ref_big = dueling_q_reference(state_big, params)
    assert out_big.shape == (200, ACTION_SIZE)
    assert jnp.allclose(out_big, ref_big, atol=1e-5, rtol=1e-5), "mismatch vs reference (B=200)"

    # Large-batch path with the default 2048-row tile (single big MXU-filling tile).
    key, khuge = jax.random.split(key)
    state_huge = jax.random.normal(khuge, (2048, STATE_SIZE), jnp.float32)
    out_huge = jax.block_until_ready(dueling_q_forward(state_huge, packed))
    ref_huge = dueling_q_reference(state_huge, params)
    assert jnp.allclose(out_huge, ref_huge, atol=1e-5, rtol=1e-5), "mismatch vs reference (B=2048)"

    print("KERNEL_OK")
</pallas_src>

<mosaic_0001>
module attributes {stable_mosaic.version = 11 : i64} {
  func.func @kernel(%arg0: i32, %arg1: memref<8x8xf32, #tpu.memory_space<vmem>>, %arg2: memref<208x128xf32, #tpu.memory_space<vmem>>, %arg3: memref<8x4xf32, #tpu.memory_space<vmem>>) attributes {dimension_semantics = [#tpu.dimension_semantics<arbitrary>], iteration_bounds = array<i64: 1>, scalar_prefetch = 0 : i64, scratch_operands = 0 : i64, tpu.core_type = #tpu.core_type<tc>, window_params = [{transform_indices = @transform_0, window_bounds = array<i64: 8, 8>}, {pipeline_mode = #tpu.pipeline_mode<synchronous>, transform_indices = @transform_1, window_bounds = array<i64: 208, 128>}, {transform_indices = @transform_2, window_bounds = array<i64: 8, 4>}]} {
    %c0 = arith.constant 0 : index
    %c0_0 = arith.constant 0 : index
    %0 = vector.load %arg1[%c0, %c0_0] : memref<8x8xf32, #tpu.memory_space<vmem>>, vector<8x8xf32>
    %c0_1 = arith.constant 0 : index
    %c0_2 = arith.constant 0 : index
    %1 = vector.load %arg2[%c0_1, %c0_2] : memref<208x128xf32, #tpu.memory_space<vmem>>, vector<8x64xf32>
    %c8 = arith.constant 8 : index
    %c0_3 = arith.constant 0 : index
    %2 = vector.load %arg2[%c8, %c0_3] : memref<208x128xf32, #tpu.memory_space<vmem>>, vector<64x64xf32>
    %c72 = arith.constant 72 : index
    %c0_4 = arith.constant 0 : index
    %3 = vector.load %arg2[%c72, %c0_4] : memref<208x128xf32, #tpu.memory_space<vmem>>, vector<64x64xf32>
    %c136 = arith.constant 136 : index
    %c0_5 = arith.constant 0 : index
    %4 = vector.load %arg2[%c136, %c0_5] : memref<208x128xf32, #tpu.memory_space<vmem>>, vector<64x5xf32>
    %c200 = arith.constant 200 : index
    %c0_6 = arith.constant 0 : index
    %5 = vector.load %arg2[%c200, %c0_6] : memref<208x128xf32, #tpu.memory_space<vmem>>, vector<8x128xf32>
    %6 = vector.extract_strided_slice %5 {offsets = [0, 0], sizes = [1, 64], strides = [1, 1]} : vector<8x128xf32> to vector<1x64xf32>
    %7 = vector.extract_strided_slice %5 {offsets = [1, 0], sizes = [1, 64], strides = [1, 1]} : vector<8x128xf32> to vector<1x64xf32>
    %8 = vector.extract_strided_slice %5 {offsets = [2, 0], sizes = [1, 64], strides = [1, 1]} : vector<8x128xf32> to vector<1x64xf32>
    %9 = vector.extract_strided_slice %5 {offsets = [3, 0], sizes = [1, 5], strides = [1, 1]} : vector<8x128xf32> to vector<1x5xf32>
    %cst = arith.constant dense<0.000000e+00> : vector<8x64xf32>
    %10 = tpu.matmul %0, %1, %cst {dimension_numbers = #tpu.dot_dimension_numbers<[1], [0], [0], [1], [0, 0, 1, 1], [], []>} : vector<8x8xf32>, vector<8x64xf32>, vector<8x64xf32> -> vector<8x64xf32>
    %11 = vector.broadcast %6 : vector<1x64xf32> to vector<8x64xf32>
    %12 = arith.addf %10, %11 : vector<8x64xf32>
    %cst_7 = arith.constant 0.000000e+00 : f32
    %13 = vector.broadcast %cst_7 : f32 to vector<8x64xf32>
    %14 = arith.maximumf %12, %13 : vector<8x64xf32>
    %cst_8 = arith.constant dense<0.000000e+00> : vector<8x64xf32>
    %15 = tpu.matmul %14, %2, %cst_8 {dimension_numbers = #tpu.dot_dimension_numbers<[1], [0], [0], [1], [0, 0, 1, 1], [], []>} : vector<8x64xf32>, vector<64x64xf32>, vector<8x64xf32> -> vector<8x64xf32>
    %16 = vector.broadcast %7 : vector<1x64xf32> to vector<8x64xf32>
    %17 = arith.addf %15, %16 : vector<8x64xf32>
    %cst_9 = arith.constant 0.000000e+00 : f32
    %18 = vector.broadcast %cst_9 : f32 to vector<8x64xf32>
    %19 = arith.maximumf %17, %18 : vector<8x64xf32>
    %cst_10 = arith.constant dense<0.000000e+00> : vector<8x64xf32>
    %20 = tpu.matmul %19, %3, %cst_10 {dimension_numbers = #tpu.dot_dimension_numbers<[1], [0], [0], [1], [0, 0, 1, 1], [], []>} : vector<8x64xf32>, vector<64x64xf32>, vector<8x64xf32> -> vector<8x64xf32>
    %21 = vector.broadcast %8 : vector<1x64xf32> to vector<8x64xf32>
    %22 = arith.addf %20, %21 : vector<8x64xf32>
    %cst_11 = arith.constant 0.000000e+00 : f32
    %23 = vector.broadcast %cst_11 : f32 to vector<8x64xf32>
    %24 = arith.maximumf %22, %23 : vector<8x64xf32>
    %cst_12 = arith.constant dense<0.000000e+00> : vector<8x5xf32>
    %25 = tpu.matmul %24, %4, %cst_12 {dimension_numbers = #tpu.dot_dimension_numbers<[1], [0], [0], [1], [0, 0, 1, 1], [], []>} : vector<8x64xf32>, vector<64x5xf32>, vector<8x5xf32> -> vector<8x5xf32>
    %26 = vector.broadcast %9 : vector<1x5xf32> to vector<8x5xf32>
    %27 = arith.addf %25, %26 : vector<8x5xf32>
    %28 = vector.extract_strided_slice %27 {offsets = [0, 0], sizes = [8, 4], strides = [1, 1]} : vector<8x5xf32> to vector<8x4xf32>
    %29 = vector.extract_strided_slice %27 {offsets = [0, 4], sizes = [8, 1], strides = [1, 1]} : vector<8x5xf32> to vector<8x1xf32>
    %30 = vector.broadcast %29 : vector<8x1xf32> to vector<8x4xf32>
    %31 = arith.addf %30, %28 : vector<8x4xf32>
    %cst_13 = arith.constant dense<0.000000e+00> : vector<8xf32>
    %32 = vector.multi_reduction <add>, %28, %cst_13 [1] : vector<8x4xf32> to vector<8xf32>
    %33 = vector.shape_cast %32 : vector<8xf32> to vector<8x1xf32>
    %cst_14 = arith.constant 4.000000e+00 : f32
    %34 = vector.broadcast %cst_14 : f32 to vector<8x1xf32>
    %35 = arith.divf %33, %34 : vector<8x1xf32>
    %36 = vector.broadcast %35 : vector<8x1xf32> to vector<8x4xf32>
    %37 = arith.subf %31, %36 : vector<8x4xf32>
    %c0_15 = arith.constant 0 : index
    %c0_16 = arith.constant 0 : index
    %38 = vector.load %arg3[%c0_15, %c0_16] : memref<8x4xf32, #tpu.memory_space<vmem>>, vector<8x4xf32>
    tpu.vector_store %arg3[%c0_15, %c0_16], %37 {strides = array<i32>} : memref<8x4xf32, #tpu.memory_space<vmem>>, vector<8x4xf32>,
    return
  }
  func.func @transform_0(%arg0: i32) -> (i32, i32) {
    %c0_i32 = arith.constant 0 : i32
    %c0_i32_0 = arith.constant 0 : i32
    return %arg0, %c0_i32 : i32, i32
  }
  func.func @transform_1(%arg0: i32) -> (i32, i32) {
    %c0_i32 = arith.constant 0 : i32
    %c0_i32_0 = arith.constant 0 : i32
    %c0_i32_1 = arith.constant 0 : i32
    return %c0_i32, %c0_i32_0 : i32, i32
  }
  func.func @transform_2(%arg0: i32) -> (i32, i32) {
    %c0_i32 = arith.constant 0 : i32
    %c0_i32_0 = arith.constant 0 : i32
    return %arg0, %c0_i32 : i32, i32
  }
}

</mosaic_0001>

<bundles_post_ra>
// kernel: tpu_custom_call.1
= control target key start
LH: loop header
LB: loop body
LE: loop exit
PB: predicated region body
PF: predicated region fallthrough
CT: control target
= control target key end

     0   :  { %7 = vsyncpa [#allocation3], 0  ;;  %s714_s0 = inlined_call_operand.hbm [shape: f32[2,8], index: 0, kind: input, shape index: {}]   ;;  %s715_s1 = inlined_call_operand.hbm [shape: f32[208,128], index: 1, kind: input, shape index: {}]   ;;  %s716_s2 = inlined_call_operand.hbm [shape: f32[2,4], index: 2, kind: output, shape index: {}]  }
   0x1   :  { %8 = vsyncpa [#allocation6], 0 }
   0x2   :  { %9 = vsyncpa [#allocation4], 0 }
   0x3   :  { %14 = vsyncadd [#allocation3], 96  ;;  %s627_s9 = smov [#allocation2]   ;;  %s555_s13 = scalar_lea.hbm %s714_s0, 32 }
   0x4   :  { %s15_s10 = sshll.u32 %s627_s9, 4  ;;  %p556_p0 = scmp.ne.s32.totalorder %s714_s0, %s555_s13  ;;  %s16_s10 = int_to_ptr.vmem [resolvable:$true] %s15_s10 }
   0x5   :  { %p559_p1 = scmp.lt.u32.totalorder %s555_s13, %s714_s0 }
   0x7   :  { %p561_p2 = pnand %p559_p1, %p556_p0 }
   0x9   :  { %564 = shalt.err (!%p561_p2)
}
   0xa   :  { %s565_s18 = scalar_lea.vmem %s16_s10, 32  ;;  %s569_s19 = scalar_lea.vmem %s16_s10, 128 }
   0xb   :  { %p566_p3 = scmp.ne.s32.totalorder %s16_s10, %s565_s18  ;;  %p570_p4 = scmp.lt.s32.totalorder %s16_s10, %s16_s10 }
   0xc   :  { %p571_p5 = scmp.lt.s32.totalorder %s569_s19, %s565_s18 }
   0xe   :  { %p572_p6 = por %p571_p5, %p570_p4 }
  0x10   :  { %p573_p7 = pnand %p572_p6, %p566_p3 }
  0x12   :  { %576 = shalt.err (!%p573_p7)
}
  0x13   :  { %s628_s20 = smov 32   ;;  %s629_s21 = smov 2  }
  0x14   :  { %21 = dma.hbm_to_vmem [thread:$0]  %s714_s0, 32, %s16_s10, [#allocation3], %s628_s20, %s628_s20, %s629_s21  }
  0x15   :  { %s630_s24 = smov [#allocation5]   ;;  %s577_s28 = scalar_lea.hbm %s715_s1, 3328 }
  0x16   :  { %s27_s25 = sshll.u32 %s630_s24, 4  ;;  %p578_p8 = scmp.ne.s32.totalorder %s715_s1, %s577_s28  ;;  %s28_s25 = int_to_ptr.vmem [resolvable:$true] %s27_s25 }
  0x17   :  { %p581_p9 = scmp.lt.u32.totalorder %s577_s28, %s715_s1 }
  0x19   :  { %p583_p10 = pnand %p581_p9, %p578_p8 }
  0x1b   :  { %586 = shalt.err (!%p583_p10)
}
  0x1c   :  { %s587_s5 = scalar_lea.vmem %s28_s25, 3328  ;;  %p592_p12 = scmp.lt.s32.totalorder %s28_s25, %s28_s25 }
  0x1d   :  { %p588_p11 = scmp.ne.s32.totalorder %s28_s25, %s587_s5  ;;  %p593_p13 = scmp.lt.s32.totalorder %s587_s5, %s587_s5 }
  0x1f   :  { %p594_p0 = por %p593_p13, %p592_p12 }
  0x21   :  { %p595_p1 = pnand %p594_p0, %p588_p11 }
  0x23   :  { %598 = shalt.err (!%p595_p1)
}
  0x24   :  { %s631_s0 = smov 128   ;;  %s632_s6 = smov 8  }
  0x25   :  { %33 = dma.hbm_to_vmem [thread:$0]  %s715_s1, 3328, %s28_s25, [#allocation6], %s631_s0, %s631_s0, %s632_s6  }
  0x26   :  { %621 = dma.done.wait [#allocation3], 128  }
  0x27   :  { %622 = vsyncadd [#allocation3], 4294967168 }
  0x28   :  { %623 = dma.done.wait [#allocation6], 3328  }
  0x29   :  { %624 = vsyncadd [#allocation6], 4294963968  ;;  %v633_v0 = vmov 0.0   ;;  %vm634_vm0 = vmmov 0   ;;  %v635_v1 = vmov 0.0|0.0   ;;  %vm71_vm1 = vcmask 64512  }
  0x2a   :  { %445 = vmatprep.subr.mxu0 %v633_v0  ;;  %447 = vmatprep.mubr.msk.f32.mxu0 %vm634_vm0, %v633_v0  ;;  %v41_v2 = vld [vmem:[#allocation5] sm:$0xff]  ;;  %v40_v3 = vld [vmem:[#allocation2] sm:$0xff]  ;;  %v42_v4 = vld [vmem:[#allocation5 + $0x8] sm:$0xff]  ;;  %v67_v25 = vlaneseq  ;;  %vm150_vm2 = vcmask 523264   ;;  %v636_v61 = vmov 4   ;;  %vm386_vm3 = vcmask 31744  }
  0x2b   :  { %507 = vmatprep.subr.bf16.mxu1 %v635_v1  ;;  %466 = vmatprep.mubr.msk.f32.mxu1 %vm634_vm0, %v633_v0  ;;  %v43_v5 = vld [vmem:[#allocation5 + $0x10] sm:$0xff]  ;;  %v44_v6 = vld [vmem:[#allocation5 + $0x18] sm:$0xff]  ;;  %v45_v7 = vld [vmem:[#allocation5 + $0x20] sm:$0xff] }
  0x2c   :  { %446 = vmatpush3.msra.mxu0 %v41_v2  ;;  %v508_v8 = vpack.c.bf16 %v43_v5, %v42_v4  ;;  %v511_v9 = vpack.c.bf16 %v45_v7, %v44_v6  ;;  %v46_v10 = vld [vmem:[#allocation5 + $0x28] sm:$0xff]  ;;  %v47_v11 = vld [vmem:[#allocation5 + $0x30] sm:$0xff]  ;;  %v48_v13 = vld [vmem:[#allocation5 + $0x38] sm:$0xff]  ;;  %v68_v26 = vshrl.u32 %v67_v25, 7  ;;  %554 = vset.pattern.permute.xlu0 %v636_v61 }
  0x2d   :  { %448 = vmatmul.mubr.msk.f32.vlgmr.msra.gmra.mrb[0].mxu0 %vm71_vm1, %v40_v3  ;;  %519 = vmatprep.subr.bf16.mxu0 %v635_v1  ;;  %v514_v12 = vpack.c.bf16 %v47_v11, %v46_v10  ;;  %v49_v14 = vld [vmem:[#allocation5 + $0x40] sm:$0xff]  ;;  %v50_v16 = vld [vmem:[#allocation5 + $0x48] sm:$0xff]  ;;  %v51_v17 = vld [vmem:[#allocation5 + $0x50] sm:$0xff] }
  0x2e   :  { %485 = vmatprep.mubr.msk.f32.mxu0 %vm634_vm0, %v633_v0  ;;  %509 = vmatpush3.bf16.msra.mxu1 %v508_v8  ;;  %v517_v15 = vpack.c.bf16 %v49_v14, %v48_v13  ;;  %v52_v18 = vld [vmem:[#allocation5 + $0x58] sm:$0xff]  ;;  %v520_v19 = vpack.c.bf16 %v51_v17, %v50_v16  ;;  %v53_v20 = vld [vmem:[#allocation5 + $0x60] sm:$0xff]  ;;  %v54_v22 = vld [vmem:[#allocation5 + $0x68] sm:$0xff]  ;;  %v69_v27 = vsub.s32 0, %v68_v26  ;;  %v148_v46 = vsub.s32 1, %v68_v26 }
  0x2f   :  { %510 = vmatprep.subr.bf16.mxu1 %v635_v1  ;;  %v523_v21 = vpack.c.bf16 %v53_v20, %v52_v18  ;;  %v55_v23 = vld [vmem:[#allocation5 + $0x70] sm:$0xff]  ;;  %v66_v28 = vld [vmem:[#allocation5 + $0xc8] sm:$0xff]  ;;  %v56_v34 = vld [vmem:[#allocation5 + $0x78] sm:$0xff]  ;;  %v227_v55 = vsub.s32 2, %v68_v26  ;;  %v305_v62 = vsub.s32 3, %v68_v26 }
  0x30   :  { %521 = vmatpush3.bf16.msra.mxu0 %v520_v19  ;;  %v526_v24 = vpack.c.bf16 %v55_v23, %v54_v22  ;;  %v70_v29 = vrot.slane %v66_v28, %v69_v27  ;;  %v57_v35 = vld [vmem:[#allocation5 + $0x80] sm:$0xff]  ;;  %v58_v37 = vld [vmem:[#allocation5 + $0x88] sm:$0xff]  ;;  %v59_v38 = vld [vmem:[#allocation5 + $0x90] sm:$0xff]  ;;  %v149_v47 = vrot.slane %v66_v28, %v148_v46 }
  0x31   :  { %522 = vmatprep.subr.bf16.mxu0 %v635_v1  ;;  %v529_v36 = vpack.c.bf16 %v57_v35, %v56_v34  ;;  %v60_v39 = vld [vmem:[#allocation5 + $0x98] sm:$0xff]  ;;  %v532_v40 = vpack.c.bf16 %v59_v38, %v58_v37  ;;  %v61_v41 = vld [vmem:[#allocation5 + $0xa0] sm:$0xff]  ;;  %v62_v43 = vld [vmem:[#allocation5 + $0xa8] sm:$0xff]  ;;  %v228_v56 = vrot.slane %v66_v28, %v227_v55  ;;  %v306_v63 = vrot.slane %v66_v28, %v305_v62 }
  0x32   :  { %512 = vmatpush3.bf16.msra.mxu1 %v511_v9  ;;  %v535_v42 = vpack.c.bf16 %v61_v41, %v60_v39  ;;  %v63_v44 = vld [vmem:[#allocation5 + $0xb0] sm:$0xff]  ;;  %v64_v52 = vld [vmem:[#allocation5 + $0xb8] sm:$0xff]  ;;  %v65_v53 = vld [vmem:[#allocation5 + $0xc0] sm:$0xff] }
  0x33   :  { %513 = vmatprep.subr.bf16.mxu1 %v635_v1  ;;  %v538_v45 = vpack.c.bf16 %v63_v44, %v62_v43  ;;  %v541_v54 = vpack.c.bf16 %v65_v53, %v64_v52 }
  0x34   :  { %524 = vmatpush3.bf16.msra.mxu0 %v523_v21 }
  0x35   :  { %525 = vmatprep.subr.bf16.mxu0 %v635_v1 }
  0x36   :  { %515 = vmatpush3.bf16.msra.mxu1 %v514_v12 }
  0x37   :  { %516 = vmatprep.subr.bf16.mxu1 %v635_v1 }
  0x38   :  { %527 = vmatpush3.bf16.msra.mxu0 %v526_v24 }
  0x39   :  { %528 = vmatprep.subr.bf16.mxu0 %v635_v1 }
  0x3a   :  { %518 = vmatpush3.bf16.msra.mxu1 %v517_v15 }
  0x3b   :  { %531 = vmatprep.subr.bf16.mxu1 %v635_v1 }
  0x3c   :  { %530 = vmatpush3.bf16.msra.mxu0 %v529_v36 }
 0x100   :  { %v141_v30 = vpop.f32.mrb[0].mxu0 }
 0x101   :  { %v142_v31 = vadd.f32 %v141_v30, %v70_v29  ;;  %v449_v32 = vpop.f32.mrb[1].mxu0 }
 0x103   :  { %v145_v33 = vmax.f32 %v142_v31, 0.0 }
 0x105   :  { %467 = vmatmul.mubr.msk.f32.vlgmr.msra.gmra.mrb[0].mxu1 %vm150_vm2, %v145_v33 }
 0x106   :  { %504 = vmatprep.mubr.msk.f32.mxu1 %vm634_vm0, %v633_v0  ;;  %533 = vmatpush3.bf16.msra.mxu1 %v532_v40 }
 0x107   :  { %534 = vmatprep.subr.bf16.mxu1 %v635_v1 }
 0x10a   :  { %536 = vmatpush3.bf16.msra.mxu1 %v535_v42 }
 0x10b   :  { %537 = vmatprep.subr.bf16.mxu1 %v635_v1 }
 0x10e   :  { %539 = vmatpush3.bf16.msra.mxu1 %v538_v45 }
 0x10f   :  { %540 = vmatprep.subr.bf16.mxu1 %v635_v1 }
 0x112   :  { %542 = vmatpush3.bf16.msra.mxu1 %v541_v54 }
 0x1d8   :  { %v220_v48 = vpop.f32.mrb[0].mxu1 }
 0x1d9   :  { %v221_v49 = vadd.f32 %v220_v48, %v149_v47  ;;  %v468_v50 = vpop.f32.mrb[1].mxu1 }
 0x1db   :  { %v224_v51 = vmax.f32 %v221_v49, 0.0 }
 0x1dd   :  { %486 = vmatmul.mubr.msk.f32.vlgmr.msra.gmra.mrb[2].mxu0 %vm150_vm2, %v224_v51 }
 0x2b0   :  { %v298_v57 = vpop.f32.mrb[2].mxu0 }
 0x2b1   :  { %v299_v58 = vadd.f32 %v298_v57, %v228_v56  ;;  %v487_v59 = vpop.f32.mrb[3].mxu0 }
 0x2b3   :  { %v302_v60 = vmax.f32 %v299_v58, 0.0 }
 0x2b5   :  { %505 = vmatmul.mubr.msk.f32.vlgmr.msra.gmra.mrb[2].mxu1 %vm150_vm2, %v302_v60 }
 0x388   :  { %v376_v0 = vpop.f32.mrb[2].mxu1 }
 0x389   :  { %v377_v1 = vadd.f32 %v376_v0, %v306_v63  ;;  %v506_v2 = vpop.f32.mrb[3].mxu1 }
 0x38b   :  { %v387_v3 = vsel %vm386_vm3, %v377_v1, 0.0 }
 0x38c   :  { %388 = vadd.xlane.f32.xlu0 %v387_v3 }
 0x3a2   :  { %382 = vperm.xlu0 %554, %v377_v1  }
 0x419   :  { %v389_v4 = vpop.xlane.xlu0 %388 }
 0x41a   :  { %v391_v6 = vmul.f32 0.25, %v389_v4 }
 0x421   :  { %v383_v5 = vpop.permute.xlu0 %382 }
 0x422   :  { %v385_v7 = vadd.f32 %v383_v5, %v377_v1 }
 0x424   :  { %v392_v8 = vsub.f32 %v385_v7, %v391_v6 }
 0x426   :  { %393 = vst.msk [vmem:[#allocation7] sm:$0xff] %vm386_vm3, %v392_v8 }
 0x427   :  { %398 = vsyncadd [#allocation4], 96  ;;  %s637_s1 = smov [#allocation7]  }
 0x428   :  { %s399_s9 = sshll.u32 %s637_s1, 4  ;;  %s400_s9 = int_to_ptr.vmem [resolvable:$true] %s399_s9 }
 0x429   :  { %s599_s10 = scalar_lea.vmem %s400_s9, 32  ;;  %s603_s11 = scalar_lea.vmem %s400_s9, 128 }
 0x42a   :  { %p600_p2 = scmp.ne.s32.totalorder %s400_s9, %s599_s10  ;;  %p604_p3 = scmp.lt.s32.totalorder %s400_s9, %s400_s9 }
 0x42b   :  { %p605_p4 = scmp.lt.s32.totalorder %s603_s11, %s599_s10 }
 0x42d   :  { %p606_p5 = por %p605_p4, %p604_p3 }
 0x42f   :  { %p607_p6 = pnand %p606_p5, %p600_p2 }
 0x431   :  { %610 = shalt.err (!%p607_p6)
}
 0x432   :  { %s611_s14 = scalar_lea.hbm %s716_s2, 32 }
 0x433   :  { %p612_p7 = scmp.ne.s32.totalorder %s716_s2, %s611_s14  ;;  %p615_p8 = scmp.lt.u32.totalorder %s611_s14, %s716_s2 }
 0x435   :  { %p617_p9 = pnand %p615_p8, %p612_p7 }
 0x437   :  { %620 = shalt.err (!%p617_p9)
}
 0x438   :  { %405 = dma.vmem_to_hbm [thread:$0]  %s400_s9, 32, %s716_s2, [#allocation4], %s628_s20, %s628_s20, %s629_s21  }
 0x439   :  { %625 = dma.done.wait [#allocation4], 128  }
 0x43a   :  { %626 = vsyncadd [#allocation4], 4294967168 }
 0x43b   :  { %409 = vsyncpa [#allocation3], 1 }
 0x43c   :  { %410 = vsyncpa [#allocation6], 1 }
 0x43d   :  { %411 = vsyncpa [#allocation4], 1 }

</bundles_post_ra>
